<compile_context>
chip_gen: v7x
topology: tpu7x:2x2x1
jax: 0.10.0
libtpu: 0.0.40
codegen_flags: <defaults>
</compile_context>

<pallas_src>
import functools

import jax
import jax.numpy as jnp
from jax.experimental import pallas as pl
from jax.experimental.pallas import tpu as pltpu


def _round_up(x, m):
    return (x + m - 1) // m * m


def temporal_block_kernel(*refs, dilation, K, H, hx, cout_p, fuse_ds):
    """One (batch row, L-tile) grid step.

    Carried state (VMEM scratch, persists across the inner "arbitrary" L axis):
      xpad_ref : (hx + tl, Cin_p)  rows [hx-H, hx) = x tail of the previous tile,
                                   rows [hx, hx+tl) = current x tile (8-aligned store).
      h1pad_ref: (hx + tl, Cout_p) same layout for relu(conv1) (= conv2's input).
    """
    if fuse_ds:
        x_ref, w1k_ref, w1w_ref, b1w_ref, w2_ref, b2_ref, o_ref, *scratch = refs
    else:
        x_ref, w1k_ref, b1_ref, wds_ref, bds_ref, w2_ref, b2_ref, o_ref, *scratch = refs

    f32 = jnp.float32
    tl = x_ref.shape[1]
    l = pl.program_id(1)
    x_cur = x_ref[0]                                        # (tl, Cin_p)

    if H > 0:
        xpad_ref, h1pad_ref = scratch

        @pl.when(l == 0)                                    # sequence start: causal zeros
        def _():
            xpad_ref[pl.ds(hx - H, H), :] = jnp.zeros((H, xpad_ref.shape[1]), xpad_ref.dtype)
            h1pad_ref[pl.ds(hx - H, H), :] = jnp.zeros((H, h1pad_ref.shape[1]), h1pad_ref.dtype)

        xpad_ref[pl.ds(hx, tl), :] = x_cur                  # 8-sublane-aligned staging store

        def x_tap(k):                                       # x[t - (K-1-k)*dilation]
            return xpad_ref[pl.ds(hx - H + k * dilation, tl), :]

        def h_tap(k):                                       # h1[t - (K-1-k)*dilation]
            return h1pad_ref[pl.ds(hx - H + k * dilation, tl), :]

    # ---- conv1 (+ fused 1x1 downsample when Cout is lane-dense) -----------------
    if fuse_ds:
        # tap k = K-1 touches x at the current timestep; its weight is widened with the
        # residual 1x1 weight -> one 2*Cout_p-wide MXU matmul, lane-sliced afterwards.
        wide = jnp.dot(x_cur, w1w_ref[...], preferred_element_type=f32) + b1w_ref[...]
        h1 = wide[:, :cout_p]
        res = wide[:, cout_p:]
    else:
        h1 = jnp.dot(x_cur, w1k_ref[K - 1], preferred_element_type=f32) + b1_ref[...]
        res = jnp.dot(x_cur, wds_ref[...], preferred_element_type=f32) + bds_ref[...]
    for k in range(K - 1):                                  # remaining causal taps
        h1 = h1 + jnp.dot(x_tap(k), w1k_ref[k], preferred_element_type=f32)
    h1 = jnp.maximum(h1, 0.0)                               # relu1 (dropout1 = identity)

    # ---- conv2 -------------------------------------------------------------------
    h1mm = h1.astype(w2_ref.dtype)
    if H > 0:
        h1pad_ref[pl.ds(hx, tl), :] = h1mm                  # 8-aligned staging store
    h2 = jnp.dot(h1mm, w2_ref[K - 1], preferred_element_type=f32) + b2_ref[...]
    for k in range(K - 1):
        h2 = h2 + jnp.dot(h_tap(k), w2_ref[k], preferred_element_type=f32)
    h2 = jnp.maximum(h2, 0.0)                               # relu2 (dropout2 = identity)

    # ---- carry the x / h1 tails for the next L step (after all taps were read) ----
    if H > 0:
        xpad_ref[pl.ds(hx - H, H), :] = x_cur[tl - H:, :]
        h1pad_ref[pl.ds(hx - H, H), :] = h1mm[tl - H:, :]

    # ---- residual add + final relu -------------------------------------------------
    o_ref[0] = jnp.maximum(h2 + res, 0.0).astype(o_ref.dtype)


def temporal_block(x_blc, w1, b1, w2, b2, w_ds, b_ds, *, dilation, block_l=1024,
                   use_bf16_matmul=False, vmem_budget_bytes=24 * 1024 * 1024):
    """x_blc: (B, L, Cin).  w1: (K, Cin, Cout).  w2: (K, Cout, Cout).
       w_ds: (1, Cin, Cout) (identity when the module's downsample is None).
       b1/b2/b_ds: (1, Cout).  Returns (B, L, Cout) float32."""
    B, L, Cin = x_blc.shape
    K, _, Cout = w1.shape
    H = (K - 1) * dilation
    f32 = jnp.float32
    mm_dtype = jnp.bfloat16 if use_bf16_matmul else jnp.float32

    # Channel widths: lane-dense (multiple of 128) only for >=128 channels; tiny
    # channel counts keep their natural width (bandwidth-bound kernel).
    Cin_p = _round_up(Cin, 128) if Cin >= 128 else Cin
    Cout_p = _round_up(Cout, 128) if Cout >= 128 else Cout
    fuse_ds = Cout_p % 128 == 0            # fuse the 1x1 residual into conv1's last tap

    hx = _round_up(H, 8) if H > 0 else 0   # 8-aligned carry head inside the scratch

    # --- L tile: as large as the VMEM budget allows (per-grid-step overhead ~0.35us),
    # --- at least H rows (one tile must cover the causal carry), multiple of 8.
    itm = 2 if use_bf16_matmul else 4

    def vmem_estimate(tl):
        est = 2 * tl * Cin_p * itm                          # x tile (double-buffered)
        est += 2 * tl * Cout_p * 4                          # output tile (double-buffered)
        if H > 0:
            est += (hx + tl) * (Cin_p + Cout_p) * itm       # carry scratch
        est += (K - 1) * tl * max(Cin_p, Cout_p) * itm      # shifted tap copies
        est += (3 + (1 if fuse_ds else 0)) * tl * Cout_p * 4  # h1 / h2 / res / wide temps
        w_elems = K * Cin_p * Cout_p + K * Cout_p * Cout_p + Cin_p * Cout_p
        est += 2 * w_elems * itm + 8 * Cout_p * 4           # weights (double-buffered) + biases
        return est

    tl_min = _round_up(max(H, 8), 8)
    tl = max(tl_min, min(_round_up(block_l, 8), _round_up(L, 8)))
    while tl > tl_min and vmem_estimate(tl) > vmem_budget_bytes:
        tl = max(tl_min, _round_up(tl // 2, 8))

    Lp = _round_up(L, tl)
    num_l = Lp // tl

    # --- operands (channel / L padding; matmul operand dtype) -------------------------
    xp = jnp.zeros((B, Lp, Cin_p), mm_dtype).at[:, :L, :Cin].set(x_blc.astype(mm_dtype))

    def pad_w(w, cip, cop):                # (K', ci, co) -> (K', cip, cop) in mm_dtype
        kk, ci, co = w.shape
        return jnp.zeros((kk, cip, cop), mm_dtype).at[:, :ci, :co].set(w.astype(mm_dtype))

    def pad_b(b):                          # biases stay f32 (added after f32 accumulation)
        return jnp.zeros((1, Cout_p), f32).at[:, :Cout].set(b.astype(f32))

    w2p = pad_w(w2, Cout_p, Cout_p)                               # (K, Cout_p, Cout_p)
    b1p, b2p, bdp = pad_b(b1), pad_b(b2), pad_b(b_ds)
    wdsp = pad_w(w_ds, Cin_p, Cout_p)[0]                          # (Cin_p, Cout_p)

    if fuse_ds:
        w1_last = pad_w(w1[K - 1:K], Cin_p, Cout_p)[0]            # (Cin_p, Cout_p)
        w1w = jnp.concatenate([w1_last, wdsp], axis=1)            # (Cin_p, 2*Cout_p)
        b1w = jnp.concatenate([b1p, bdp], axis=1)                 # (1, 2*Cout_p)
        w1k_src = w1[:K - 1] if K > 1 else jnp.zeros((1, Cin, Cout), f32)
        w1k = pad_w(w1k_src, Cin_p, Cout_p)                       # (max(K-1,1), Cin_p, Cout_p)
        args = (xp, w1k, w1w, b1w, w2p, b2p)
    else:
        w1k = pad_w(w1, Cin_p, Cout_p)                            # (K, Cin_p, Cout_p)
        args = (xp, w1k, b1p, wdsp, bdp, w2p, b2p)

    def const_spec(a):                     # weight/bias blocks: whole array, index 0
        return pl.BlockSpec(a.shape, lambda b, l: (0,) * a.ndim)

    in_specs = [pl.BlockSpec((1, tl, Cin_p), lambda b, l: (b, l, 0))]
    in_specs += [const_spec(a) for a in args[1:]]

    scratch_shapes = []
    if H > 0:
        scratch_shapes = [pltpu.VMEM((hx + tl, Cin_p), mm_dtype),    # x carry + staging
                          pltpu.VMEM((hx + tl, Cout_p), mm_dtype)]   # h1 carry + staging

    kernel = functools.partial(temporal_block_kernel, dilation=dilation, K=K, H=H,
                               hx=hx, cout_p=Cout_p, fuse_ds=fuse_ds)

    out = pl.pallas_call(
        kernel,
        out_shape=jax.ShapeDtypeStruct((B, Lp, Cout_p), f32),
        grid_spec=pltpu.PrefetchScalarGridSpec(
            num_scalar_prefetch=0,
            grid=(B, num_l),
            in_specs=in_specs,
            out_specs=pl.BlockSpec((1, tl, Cout_p), lambda b, l: (b, l, 0)),
            scratch_shapes=scratch_shapes),
        # L axis carries state in scratch -> "arbitrary"; B rows are independent ->
        # "parallel" (shards across the two TensorCores on v7x).
        compiler_params=pltpu.CompilerParams(
            dimension_semantics=("parallel", "arbitrary")),
    )(*args)

    return out[:, :L, :Cout]


# ----------------------------- pure-JAX reference -----------------------------

def _causal_conv_ref(x_blc, w_kio, b, dilation):
    """Conv1d(padding=(K-1)*dilation) followed by Chomp1d((K-1)*dilation)."""
    K = w_kio.shape[0]
    L = x_blc.shape[1]
    out = jnp.zeros(x_blc.shape[:2] + (w_kio.shape[2],), jnp.float32)
    for k in range(K):
        s = (K - 1 - k) * dilation
        xs = jnp.pad(x_blc, ((0, 0), (s, 0), (0, 0)))[:, :L, :]
        out = out + jnp.einsum("blc,co->blo", xs, w_kio[k])
    return out + b


def _temporal_block_ref(x_blc, w1, b1, w2, b2, w_ds, b_ds, dilation):
    h1 = jnp.maximum(_causal_conv_ref(x_blc, w1, b1, dilation), 0.0)
    h2 = jnp.maximum(_causal_conv_ref(h1, w2, b2, dilation), 0.0)
    res = jnp.einsum("blc,co->blo", x_blc, w_ds[0]) + b_ds
    return jnp.maximum(h2 + res, 0.0)


if __name__ == "__main__":
    key = jax.random.PRNGKey(0)

    def make_case(k, B, L, Cin, Cout, K, identity_ds):
        ks = jax.random.split(k, 7)
        x_ncl = jax.random.normal(ks[0], (B, Cin, L), jnp.float32)   # PyTorch NCL input
        x_blc = jnp.transpose(x_ncl, (0, 2, 1))                      # kernel layout (B, L, C)
        # PyTorch Conv1d weight is (Cout, Cin, K); the kernel wants (K, Cin, Cout).
        w1 = jnp.transpose(0.01 * jax.random.normal(ks[1], (Cout, Cin, K)), (2, 1, 0))
        w2 = jnp.transpose(0.01 * jax.random.normal(ks[2], (Cout, Cout, K)), (2, 1, 0))
        b1 = 0.01 * jax.random.normal(ks[3], (1, Cout))
        b2 = 0.01 * jax.random.normal(ks[4], (1, Cout))
        if identity_ds:                          # module: downsample is None -> res = x
            w_ds = jnp.eye(Cin, Cout, dtype=jnp.float32)[None]
            b_ds = jnp.zeros((1, Cout), jnp.float32)
        else:                                    # downsample = Conv1d(Cin, Cout, 1)
            w_ds = jnp.transpose(0.01 * jax.random.normal(ks[5], (Cout, Cin, 1)), (2, 1, 0))
            b_ds = 0.01 * jax.random.normal(ks[6], (1, Cout))
        return x_blc, w1, b1, w2, b2, w_ds, b_ds

    k1, k2 = jax.random.split(key)

    # Case 1: tiny channel counts (n_inputs=4, n_outputs=8, kernel_size=3, stride=1,
    # dilation=2, padding=(K-1)*dilation=4) -> unpadded-lane path + separate downsample.
    x, w1, b1, w2, b2, wd, bd = make_case(k1, B=2, L=16, Cin=4, Cout=8, K=3, identity_ds=False)
    ref = _temporal_block_ref(x, w1, b1, w2, b2, wd, bd, dilation=2)
    out_a = jax.block_until_ready(temporal_block(x, w1, b1, w2, b2, wd, bd, dilation=2))
    out_b = jax.block_until_ready(                       # multi-tile: exercises the L carry
        temporal_block(x, w1, b1, w2, b2, wd, bd, dilation=2, block_l=8))
    assert out_a.shape == (2, 16, 8) and out_b.shape == (2, 16, 8)
    assert jnp.allclose(out_a, ref, atol=1e-5, rtol=1e-3), "case1 single-tile mismatch"
    assert jnp.allclose(out_b, ref, atol=1e-5, rtol=1e-3), "case1 tiled mismatch"

    # Case 2: lane-dense channels (128 -> 128, downsample=None -> identity residual)
    # -> fused conv1 + downsample path.
    x, w1, b1, w2, b2, wd, bd = make_case(k2, B=2, L=32, Cin=128, Cout=128, K=3, identity_ds=True)
    ref = _temporal_block_ref(x, w1, b1, w2, b2, wd, bd, dilation=2)
    out_c = jax.block_until_ready(temporal_block(x, w1, b1, w2, b2, wd, bd, dilation=2))
    out_d = jax.block_until_ready(
        temporal_block(x, w1, b1, w2, b2, wd, bd, dilation=2, block_l=16))
    out_e = jax.block_until_ready(                       # bf16 MXU operands, f32 accumulation
        temporal_block(x, w1, b1, w2, b2, wd, bd, dilation=2, use_bf16_matmul=True))
    assert jnp.allclose(out_c, ref, atol=1e-5, rtol=1e-3), "case2 single-tile mismatch"
    assert jnp.allclose(out_d, ref, atol=1e-5, rtol=1e-3), "case2 tiled mismatch"
    assert jnp.allclose(out_e, ref, atol=2e-2, rtol=2e-2), "case2 bf16 mismatch"

    print("KERNEL_OK")
</pallas_src>

<mosaic_0001>
module attributes {stable_mosaic.version = 11 : i64} {
  func.func @temporal_block_kernel(%arg0: i32, %arg1: i32, %arg2: memref<1x16x4xf32, #tpu.memory_space<vmem>>, %arg3: memref<3x4x8xf32, #tpu.memory_space<vmem>>, %arg4: memref<1x8xf32, #tpu.memory_space<vmem>>, %arg5: memref<4x8xf32, #tpu.memory_space<vmem>>, %arg6: memref<1x8xf32, #tpu.memory_space<vmem>>, %arg7: memref<3x8x8xf32, #tpu.memory_space<vmem>>, %arg8: memref<1x8xf32, #tpu.memory_space<vmem>>, %arg9: memref<1x16x8xf32, #tpu.memory_space<vmem>>, %arg10: memref<24x4xf32, #tpu.memory_space<vmem>>, %arg11: memref<24x8xf32, #tpu.memory_space<vmem>>) attributes {dimension_semantics = [#tpu.dimension_semantics<parallel>, #tpu.dimension_semantics<arbitrary>], iteration_bounds = array<i64: 2, 1>, scalar_prefetch = 0 : i64, scratch_operands = 2 : i64, tpu.core_type = #tpu.core_type<tc>, window_params = [{transform_indices = @transform_0, window_bounds = array<i64: 1, 16, 4>}, {pipeline_mode = #tpu.pipeline_mode<synchronous>, transform_indices = @transform_1, window_bounds = array<i64: 3, 4, 8>}, {pipeline_mode = #tpu.pipeline_mode<synchronous>, transform_indices = @transform_2, window_bounds = array<i64: 1, 8>}, {pipeline_mode = #tpu.pipeline_mode<synchronous>, transform_indices = @transform_3, window_bounds = array<i64: 4, 8>}, {pipeline_mode = #tpu.pipeline_mode<synchronous>, transform_indices = @transform_4, window_bounds = array<i64: 1, 8>}, {pipeline_mode = #tpu.pipeline_mode<synchronous>, transform_indices = @transform_5, window_bounds = array<i64: 3, 8, 8>}, {pipeline_mode = #tpu.pipeline_mode<synchronous>, transform_indices = @transform_6, window_bounds = array<i64: 1, 8>}, {transform_indices = @transform_7, window_bounds = array<i64: 1, 16, 8>}]} {
    %c0 = arith.constant 0 : index
    %c0_0 = arith.constant 0 : index
    %c0_1 = arith.constant 0 : index
    %0 = vector.load %arg2[%c0, %c0_0, %c0_1] : memref<1x16x4xf32, #tpu.memory_space<vmem>>, vector<1x16x4xf32>
    %1 = vector.shape_cast %0 : vector<1x16x4xf32> to vector<16x4xf32>
    %c0_i32 = arith.constant 0 : i32
    %2 = arith.cmpi eq, %arg1, %c0_i32 : i32
    %3 = arith.extui %2 : i1 to i32
    %c0_i32_2 = arith.constant 0 : i32
    %4 = arith.cmpi ne, %3, %c0_i32_2 : i32
    scf.if %4 {
      %cst_52 = arith.constant 0.000000e+00 : f32
      %58 = vector.broadcast %cst_52 : f32 to vector<4x4xf32>
      %c4_53 = arith.constant 4 : index
      %c0_54 = arith.constant 0 : index
      %59 = vector.load %arg10[%c4_53, %c0_54] : memref<24x4xf32, #tpu.memory_space<vmem>>, vector<4x4xf32>
      tpu.vector_store %arg10[%c4_53, %c0_54], %58 {strides = array<i32>} : memref<24x4xf32, #tpu.memory_space<vmem>>, vector<4x4xf32>,
      %cst_55 = arith.constant 0.000000e+00 : f32
      %60 = vector.broadcast %cst_55 : f32 to vector<4x8xf32>
      %c4_56 = arith.constant 4 : index
      %c0_57 = arith.constant 0 : index
      %61 = vector.load %arg11[%c4_56, %c0_57] : memref<24x8xf32, #tpu.memory_space<vmem>>, vector<4x8xf32>
      tpu.vector_store %arg11[%c4_56, %c0_57], %60 {strides = array<i32>} : memref<24x8xf32, #tpu.memory_space<vmem>>, vector<4x8xf32>,
    } else {
    }
    %c8 = arith.constant 8 : index
    %c0_3 = arith.constant 0 : index
    %5 = vector.load %arg10[%c8, %c0_3] : memref<24x4xf32, #tpu.memory_space<vmem>>, vector<16x4xf32>
    tpu.vector_store %arg10[%c8, %c0_3], %1 {strides = array<i32>} : memref<24x4xf32, #tpu.memory_space<vmem>>, vector<16x4xf32>,
    %c2 = arith.constant 2 : index
    %c0_4 = arith.constant 0 : index
    %c0_5 = arith.constant 0 : index
    %6 = vector.load %arg3[%c2, %c0_4, %c0_5] : memref<3x4x8xf32, #tpu.memory_space<vmem>>, vector<1x4x8xf32>
    %7 = vector.shape_cast %6 : vector<1x4x8xf32> to vector<4x8xf32>
    %cst = arith.constant dense<0.000000e+00> : vector<16x8xf32>
    %8 = tpu.matmul %1, %7, %cst {dimension_numbers = #tpu.dot_dimension_numbers<[1], [0], [0], [1], [0, 0, 1, 1], [], []>} : vector<16x4xf32>, vector<4x8xf32>, vector<16x8xf32> -> vector<16x8xf32>
    %c0_6 = arith.constant 0 : index
    %c0_7 = arith.constant 0 : index
    %9 = vector.load %arg4[%c0_6, %c0_7] : memref<1x8xf32, #tpu.memory_space<vmem>>, vector<1x8xf32>
    %10 = vector.broadcast %9 : vector<1x8xf32> to vector<16x8xf32>
    %11 = arith.addf %8, %10 : vector<16x8xf32>
    %c0_8 = arith.constant 0 : index
    %c0_9 = arith.constant 0 : index
    %12 = vector.load %arg5[%c0_8, %c0_9] : memref<4x8xf32, #tpu.memory_space<vmem>>, vector<4x8xf32>
    %cst_10 = arith.constant dense<0.000000e+00> : vector<16x8xf32>
    %13 = tpu.matmul %1, %12, %cst_10 {dimension_numbers = #tpu.dot_dimension_numbers<[1], [0], [0], [1], [0, 0, 1, 1], [], []>} : vector<16x4xf32>, vector<4x8xf32>, vector<16x8xf32> -> vector<16x8xf32>
    %c0_11 = arith.constant 0 : index
    %c0_12 = arith.constant 0 : index
    %14 = vector.load %arg6[%c0_11, %c0_12] : memref<1x8xf32, #tpu.memory_space<vmem>>, vector<1x8xf32>
    %15 = vector.broadcast %14 : vector<1x8xf32> to vector<16x8xf32>
    %16 = arith.addf %13, %15 : vector<16x8xf32>
    %c4 = arith.constant 4 : index
    %c0_13 = arith.constant 0 : index
    %17 = vector.load %arg10[%c4, %c0_13] : memref<24x4xf32, #tpu.memory_space<vmem>>, vector<16x4xf32>
    %c0_14 = arith.constant 0 : index
    %c0_15 = arith.constant 0 : index
    %c0_16 = arith.constant 0 : index
    %18 = vector.load %arg3[%c0_14, %c0_15, %c0_16] : memref<3x4x8xf32, #tpu.memory_space<vmem>>, vector<1x4x8xf32>
    %19 = vector.shape_cast %18 : vector<1x4x8xf32> to vector<4x8xf32>
    %cst_17 = arith.constant dense<0.000000e+00> : vector<16x8xf32>
    %20 = tpu.matmul %17, %19, %cst_17 {dimension_numbers = #tpu.dot_dimension_numbers<[1], [0], [0], [1], [0, 0, 1, 1], [], []>} : vector<16x4xf32>, vector<4x8xf32>, vector<16x8xf32> -> vector<16x8xf32>
    %21 = arith.addf %11, %20 : vector<16x8xf32>
    %c6 = arith.constant 6 : index
    %c0_18 = arith.constant 0 : index
    %22 = vector.load %arg10[%c6, %c0_18] : memref<24x4xf32, #tpu.memory_space<vmem>>, vector<16x4xf32>
    %c1 = arith.constant 1 : index
    %c0_19 = arith.constant 0 : index
    %c0_20 = arith.constant 0 : index
    %23 = vector.load %arg3[%c1, %c0_19, %c0_20] : memref<3x4x8xf32, #tpu.memory_space<vmem>>, vector<1x4x8xf32>
    %24 = vector.shape_cast %23 : vector<1x4x8xf32> to vector<4x8xf32>
    %cst_21 = arith.constant dense<0.000000e+00> : vector<16x8xf32>
    %25 = tpu.matmul %22, %24, %cst_21 {dimension_numbers = #tpu.dot_dimension_numbers<[1], [0], [0], [1], [0, 0, 1, 1], [], []>} : vector<16x4xf32>, vector<4x8xf32>, vector<16x8xf32> -> vector<16x8xf32>
    %26 = arith.addf %21, %25 : vector<16x8xf32>
    %cst_22 = arith.constant 0.000000e+00 : f32
    %27 = vector.broadcast %cst_22 : f32 to vector<16x8xf32>
    %28 = arith.maximumf %26, %27 : vector<16x8xf32>
    %c8_23 = arith.constant 8 : index
    %c0_24 = arith.constant 0 : index
    %29 = vector.load %arg11[%c8_23, %c0_24] : memref<24x8xf32, #tpu.memory_space<vmem>>, vector<16x8xf32>
    tpu.vector_store %arg11[%c8_23, %c0_24], %28 {strides = array<i32>} : memref<24x8xf32, #tpu.memory_space<vmem>>, vector<16x8xf32>,
    %c2_25 = arith.constant 2 : index
    %c0_26 = arith.constant 0 : index
    %c0_27 = arith.constant 0 : index
    %30 = vector.load %arg7[%c2_25, %c0_26, %c0_27] : memref<3x8x8xf32, #tpu.memory_space<vmem>>, vector<1x8x8xf32>
    %31 = vector.shape_cast %30 : vector<1x8x8xf32> to vector<8x8xf32>
    %cst_28 = arith.constant dense<0.000000e+00> : vector<16x8xf32>
    %32 = tpu.matmul %28, %31, %cst_28 {dimension_numbers = #tpu.dot_dimension_numbers<[1], [0], [0], [1], [0, 0, 1, 1], [], []>} : vector<16x8xf32>, vector<8x8xf32>, vector<16x8xf32> -> vector<16x8xf32>
    %c0_29 = arith.constant 0 : index
    %c0_30 = arith.constant 0 : index
    %33 = vector.load %arg8[%c0_29, %c0_30] : memref<1x8xf32, #tpu.memory_space<vmem>>, vector<1x8xf32>
    %34 = vector.broadcast %33 : vector<1x8xf32> to vector<16x8xf32>
    %35 = arith.addf %32, %34 : vector<16x8xf32>
    %c4_31 = arith.constant 4 : index
    %c0_32 = arith.constant 0 : index
    %36 = vector.load %arg11[%c4_31, %c0_32] : memref<24x8xf32, #tpu.memory_space<vmem>>, vector<16x8xf32>
    %c0_33 = arith.constant 0 : index
    %c0_34 = arith.constant 0 : index
    %c0_35 = arith.constant 0 : index
    %37 = vector.load %arg7[%c0_33, %c0_34, %c0_35] : memref<3x8x8xf32, #tpu.memory_space<vmem>>, vector<1x8x8xf32>
    %38 = vector.shape_cast %37 : vector<1x8x8xf32> to vector<8x8xf32>
    %cst_36 = arith.constant dense<0.000000e+00> : vector<16x8xf32>
    %39 = tpu.matmul %36, %38, %cst_36 {dimension_numbers = #tpu.dot_dimension_numbers<[1], [0], [0], [1], [0, 0, 1, 1], [], []>} : vector<16x8xf32>, vector<8x8xf32>, vector<16x8xf32> -> vector<16x8xf32>
    %40 = arith.addf %35, %39 : vector<16x8xf32>
    %c6_37 = arith.constant 6 : index
    %c0_38 = arith.constant 0 : index
    %41 = vector.load %arg11[%c6_37, %c0_38] : memref<24x8xf32, #tpu.memory_space<vmem>>, vector<16x8xf32>
    %c1_39 = arith.constant 1 : index
    %c0_40 = arith.constant 0 : index
    %c0_41 = arith.constant 0 : index
    %42 = vector.load %arg7[%c1_39, %c0_40, %c0_41] : memref<3x8x8xf32, #tpu.memory_space<vmem>>, vector<1x8x8xf32>
    %43 = vector.shape_cast %42 : vector<1x8x8xf32> to vector<8x8xf32>
    %cst_42 = arith.constant dense<0.000000e+00> : vector<16x8xf32>
    %44 = tpu.matmul %41, %43, %cst_42 {dimension_numbers = #tpu.dot_dimension_numbers<[1], [0], [0], [1], [0, 0, 1, 1], [], []>} : vector<16x8xf32>, vector<8x8xf32>, vector<16x8xf32> -> vector<16x8xf32>
    %45 = arith.addf %40, %44 : vector<16x8xf32>
    %cst_43 = arith.constant 0.000000e+00 : f32
    %46 = vector.broadcast %cst_43 : f32 to vector<16x8xf32>
    %47 = arith.maximumf %45, %46 : vector<16x8xf32>
    %48 = vector.extract_strided_slice %1 {offsets = [12, 0], sizes = [4, 4], strides = [1, 1]} : vector<16x4xf32> to vector<4x4xf32>
    %c4_44 = arith.constant 4 : index
    %c0_45 = arith.constant 0 : index
    %49 = vector.load %arg10[%c4_44, %c0_45] : memref<24x4xf32, #tpu.memory_space<vmem>>, vector<4x4xf32>
    tpu.vector_store %arg10[%c4_44, %c0_45], %48 {strides = array<i32>} : memref<24x4xf32, #tpu.memory_space<vmem>>, vector<4x4xf32>,
    %50 = vector.extract_strided_slice %28 {offsets = [12, 0], sizes = [4, 8], strides = [1, 1]} : vector<16x8xf32> to vector<4x8xf32>
    %c4_46 = arith.constant 4 : index
    %c0_47 = arith.constant 0 : index
    %51 = vector.load %arg11[%c4_46, %c0_47] : memref<24x8xf32, #tpu.memory_space<vmem>>, vector<4x8xf32>
    tpu.vector_store %arg11[%c4_46, %c0_47], %50 {strides = array<i32>} : memref<24x8xf32, #tpu.memory_space<vmem>>, vector<4x8xf32>,
    %52 = arith.addf %47, %16 : vector<16x8xf32>
    %cst_48 = arith.constant 0.000000e+00 : f32
    %53 = vector.broadcast %cst_48 : f32 to vector<16x8xf32>
    %54 = arith.maximumf %52, %53 : vector<16x8xf32>
    %c0_49 = arith.constant 0 : index
    %c0_50 = arith.constant 0 : index
    %c0_51 = arith.constant 0 : index
    %55 = vector.load %arg9[%c0_49, %c0_50, %c0_51] : memref<1x16x8xf32, #tpu.memory_space<vmem>>, vector<1x16x8xf32>
    %56 = vector.shape_cast %55 : vector<1x16x8xf32> to vector<16x8xf32>
    %57 = vector.shape_cast %54 : vector<16x8xf32> to vector<1x16x8xf32>
    tpu.vector_store %arg9[%c0_49, %c0_50, %c0_51], %57 {strides = array<i32>} : memref<1x16x8xf32, #tpu.memory_space<vmem>>, vector<1x16x8xf32>,
    return
  }
  func.func @transform_0(%arg0: i32, %arg1: i32) -> (i32, i32, i32) {
    %c0_i32 = arith.constant 0 : i32
    %c0_i32_0 = arith.constant 0 : i32
    return %arg0, %arg1, %c0_i32 : i32, i32, i32
  }
  func.func @transform_1(%arg0: i32, %arg1: i32) -> (i32, i32, i32) {
    %c0_i32 = arith.constant 0 : i32
    %c0_i32_0 = arith.constant 0 : i32
    %c0_i32_1 = arith.constant 0 : i32
    %c0_i32_2 = arith.constant 0 : i32
    return %c0_i32, %c0_i32_0, %c0_i32_1 : i32, i32, i32
  }
  func.func @transform_2(%arg0: i32, %arg1: i32) -> (i32, i32) {
    %c0_i32 = arith.constant 0 : i32
    %c0_i32_0 = arith.constant 0 : i32
    %c0_i32_1 = arith.constant 0 : i32
    return %c0_i32, %c0_i32_0 : i32, i32
  }
  func.func @transform_3(%arg0: i32, %arg1: i32) -> (i32, i32) {
    %c0_i32 = arith.constant 0 : i32
    %c0_i32_0 = arith.constant 0 : i32
    %c0_i32_1 = arith.constant 0 : i32
    return %c0_i32, %c0_i32_0 : i32, i32
  }
  func.func @transform_4(%arg0: i32, %arg1: i32) -> (i32, i32) {
    %c0_i32 = arith.constant 0 : i32
    %c0_i32_0 = arith.constant 0 : i32
    %c0_i32_1 = arith.constant 0 : i32
    return %c0_i32, %c0_i32_0 : i32, i32
  }
  func.func @transform_5(%arg0: i32, %arg1: i32) -> (i32, i32, i32) {
    %c0_i32 = arith.constant 0 : i32
    %c0_i32_0 = arith.constant 0 : i32
    %c0_i32_1 = arith.constant 0 : i32
    %c0_i32_2 = arith.constant 0 : i32
    return %c0_i32, %c0_i32_0, %c0_i32_1 : i32, i32, i32
  }
  func.func @transform_6(%arg0: i32, %arg1: i32) -> (i32, i32) {
    %c0_i32 = arith.constant 0 : i32
    %c0_i32_0 = arith.constant 0 : i32
    %c0_i32_1 = arith.constant 0 : i32
    return %c0_i32, %c0_i32_0 : i32, i32
  }
  func.func @transform_7(%arg0: i32, %arg1: i32) -> (i32, i32, i32) {
    %c0_i32 = arith.constant 0 : i32
    %c0_i32_0 = arith.constant 0 : i32
    return %arg0, %arg1, %c0_i32 : i32, i32, i32
  }
}

</mosaic_0001>

<bundles_post_ra>
// kernel: tpu_custom_call.1
= control target key start
LH: loop header
LB: loop body
LE: loop exit
PB: predicated region body
PF: predicated region fallthrough
CT: control target
= control target key end

     0   :  { %s1253_s24 = smov 0   ;;  %s1255_s25 = smov 0   ;;  %s1351_s0 = inlined_call_operand.vmem [shape: f32[2,16,4], index: 0, kind: input, shape index: {}]   ;;  %s1352_s1 = inlined_call_operand.vmem [shape: f32[3,4,8], index: 1, kind: input, shape index: {}]   ;;  %s1353_s2 = inlined_call_operand.vmem [shape: f32[1,8], index: 2, kind: input, shape index: {}]   ;;  %s1354_s3 = inlined_call_operand.vmem [shape: f32[4,8], index: 3, kind: input, shape index: {}]   ;;  %s1355_s4 = inlined_call_operand.vmem [shape: f32[1,8], index: 4, kind: input, shape index: {}]   ;;  %s1356_s5 = inlined_call_operand.vmem [shape: f32[3,8,8], index: 5, kind: input, shape index: {}]   ;;  %s1357_s6 = inlined_call_operand.vmem [shape: f32[1,8], index: 6, kind: input, shape index: {}]   ;;  %s1358_s7 = inlined_call_operand.vmem [shape: f32[2,16,8], index: 7, kind: output, shape index: {}]  }
   0x1   :  { %s1257_s26 = smov 0  }
   0x2 LB: > { %s29_s27 = sadd.s32 1, %s1206_s25  ;;  %p1061_p0 = scmp.ge.s32.totalorder %s1210_s26, 1  ;;  %s1210_s26 = sphi %s1257_s26, %s17_s26   ;;  %s1206_s25 = sphi %s1255_s25, %s1360_s25   ;;  %s1202_s24 = sphi %s1253_s24, %s1359_s24  }
   0x3   : > { %p31_p1 = scmp.ge.s32.totalorder %s29_s27, 2  ;;  %p258_p2 = scmp.lt.s32.totalorder %s1210_s26, 3 }
   0x5   : > { %s1362_s27 = smov (%p31_p1, %s29_s27), 0  ;;  %p259_p3 = pnand %p1061_p0, %p258_p2 }
   0x6   : > { %v1066_v0 = vld [vmem:[%s1352_s1 + $0x8] sm:$0xf] (!%p259_p3)  ;;  %vm346_vm0 = vcmask (!%p259_p3), 1043456   ;;  %p299_p4 = scmp.lt.s32.totalorder (!%p259_p3), %s1202_s24, 1  ;;  %vm324_vm1 = vcmask (!%p259_p3), 27648   ;;  %v1212_v2 = vmov (!%p259_p3), 0.0  }
   0x7   : > { %262 = sbr.rel (%p259_p3) target bundleno = 491 (0x1eb), region = 48  ;;  %1116 = vmatprep.subr.msk.mxu0 (!%p259_p3), %vm346_vm0, %v1066_v0  ;;  %v513_v1 = vld [vmem:[%s1352_s1] sm:$0xf] (!%p259_p3)  ;;  %325 = vst.msk [vmem:[#allocation2 + $0x4] sm:$0xf] (!%p259_p3), %vm324_vm1, %v1212_v2  ;;  %vm328_vm2 = vcmask (!%p259_p3), 31744  }
   0x8   : > { %1117 = vmatpush3.msk.msra.mxu0 (!%p259_p3), %vm346_vm0, %v1066_v0  ;;  %v425_v3 = vld [vmem:[%s1354_s3] sm:$0xf] (!%p259_p3)  ;;  %v1078_v6 = vld [vmem:[%s1352_s1 + $0x4] sm:$0xf] (!%p259_p3)  ;;  %vm960_vm3 = vcmask (!%p259_p3), 31748   ;;  %v1082_v11 = vld [vmem:[%s1356_s5 + $0x10] sm:$0xff] (!%p259_p3) }
   0x9   : > { %1126 = vmatprep.subr.msk.mxu0 (!%p259_p3), %vm346_vm0, %v513_v1  ;;  %1121 = vmatprep.subr.msk.mxu1 (!%p259_p3), %vm346_vm0, %v425_v3  ;;  %vm326_vm4 = vcmask (!%p259_p3), 60416   ;;  %v787_v12 = vld [vmem:[%s1356_s5] sm:$0xff] (!%p259_p3)  ;;  %vm692_vm5 = vcmask (!%p259_p3), 64512   ;;  %v1088_v22 = vld [vmem:[%s1356_s5 + $0x8] sm:$0xff] (!%p259_p3)  ;;  %vm962_vm6 = vcmask (!%p259_p3), 64516  }
   0xa   : > { %1122 = vmatpush3.msk.msra.mxu1 (!%p259_p3), %vm346_vm0, %v425_v3  ;;  %327 = vst.msk [vmem:[#allocation3 + $0x4] sm:$0xf] (!%p259_p3), %vm326_vm4, %v1212_v2  ;;  %v1067_v15 = vld [vmem:[%s1353_s2] ss:$0 sm:$0xff] (!%p259_p3) }
   0xb   : > { %1136 = vmatprep.subr.mxu1 (!%p259_p3), %v1082_v11  ;;  %v1083_v27 = vld [vmem:[%s1357_s6] ss:$0 sm:$0xff] (!%p259_p3) }
   0xc   : > { %v1071_v28 = vld [vmem:[%s1355_s4] ss:$0 sm:$0xff] (!%p259_p3) }
   0xe   : > { %s1364_s24 = smov (!%p299_p4, %s1202_s24), 1 }
   0xf   : > { %s1093_s11 = sshll.u32 %s1364_s24, 4 }
  0x10   : > { %s306_s14 = scalar_lea.vmem %s1351_s0, %s1093_s11  ;;  %s316_s13 = scalar_lea.vmem %s1358_s7, %s1093_s11 }
  0x11   : > { %v318_v4 = vld [vmem:[%s306_s14] sm:$0xff]  ;;  %v319_v5 = vld [vmem:[%s306_s14 + $0x8] sm:$0xff] }
  0x12   : > { %329 = vst.msk [vmem:[#allocation2 + $0x8] sm:$0xff] %vm328_vm2, %v318_v4  ;;  %1118 = vmatprep.mubr.msk.f32.mxu0 %vm328_vm2, %v318_v4  ;;  %330 = vst.msk [vmem:[#allocation2 + $0x10] sm:$0xff] %vm328_vm2, %v319_v5  ;;  %1123 = vmatprep.mubr.msk.f32.mxu1 %vm328_vm2, %v318_v4 }
  0x13   : > { %1119 = vmatmul.mubr.msk.f32.vlgmr.msra.gmra.mrb[0].mxu0 %vm328_vm2, %v319_v5  ;;  %1124 = vmatmul.mubr.msk.f32.vlgmr.msra.gmra.mrb[0].mxu1 %vm328_vm2, %v319_v5 }
  0x14   : > { %1127 = vmatpush3.msk.msra.mxu0 %vm346_vm0, %v513_v1  ;;  %1137 = vmatpush3.msra.mxu1 %v1082_v11 }
  0x15   : > { %1131 = vmatprep.subr.msk.mxu0 %vm346_vm0, %v1078_v6  ;;  %1141 = vmatprep.subr.mxu1 %v787_v12 }
  0x19   : > { %v511_v7 = vld [vmem:[#allocation2 + $0x4] sm:$0xff]  ;;  %v512_v8 = vld [vmem:[#allocation2 + $0xc] sm:$0xff] }
  0x1a   : > { %v600_v9 = vld [vmem:[#allocation2 + $0x6] sm:$0xff]  ;;  %1128 = vmatprep.mubr.msk.f32.mxu0 %vm328_vm2, %v511_v7  ;;  %v601_v10 = vld [vmem:[#allocation2 + $0xe] sm:$0xff] }
  0x1b   : > { %961 = vst.msk [vmem:[#allocation2] sm:$0xf0] %vm960_vm3, %v319_v5  ;;  %1129 = vmatmul.mubr.msk.f32.vlgmr.msra.gmra.mrb[0].mxu0 %vm328_vm2, %v512_v8 }
  0x1c   : > { %1132 = vmatpush3.msk.msra.mxu0 %vm346_vm0, %v1078_v6  ;;  %1133 = vmatprep.mubr.msk.f32.mxu0 %vm328_vm2, %v600_v9 }
  0x23   : > { %1134 = vmatmul.mubr.msk.f32.vlgmr.msra.gmra.mrb[0].mxu0 %vm328_vm2, %v601_v10 }
  0xe6   : > { %v1125_v13 = vpop.f32.mrb[0].mxu1 }
  0xe7   : > { %v502_v14 = vpop.f32.mrb[1].mxu1  ;;  %v508_v33 = vadd.f32 %v1125_v13, %v1071_v28 }
  0xe8   : > { %v503_v35 = vadd.f32 %v1071_v28, %v502_v14 }
  0xf6   : > { %v1135_v16 = vpop.f32.mrb[0].mxu0 }
  0xf7   : > { %v1151_v17 = vadd.f32 %v1135_v16, %v1067_v15  ;;  %v679_v18 = vpop.f32.mrb[1].mxu0 }
  0xf8   : > { %v1152_v19 = vadd.f32 %v1067_v15, %v679_v18 }
  0xf9   : > { %v691_v20 = vmax.f32 %v1151_v17, 0.0 }
  0xfa   : > { %v690_v21 = vmax.f32 %v1152_v19, 0.0 }
  0xfb   : > { %694 = vst.msk [vmem:[#allocation3 + $0x10] sm:$0xff] %vm692_vm5, %v691_v20 }
  0xfc   : > { %693 = vst.msk [vmem:[#allocation3 + $0x8] sm:$0xff] %vm692_vm5, %v690_v21  ;;  %1138 = vmatprep.mubr.msk.f32.mxu1 %vm692_vm5, %v690_v21 }
  0xfd   : > { %1139 = vmatmul.mubr.msk.f32.vlgmr.msra.gmra.mrb[2].mxu1 %vm692_vm5, %v691_v20 }
  0xfe   : > { %1142 = vmatpush3.msra.mxu1 %v787_v12 }
  0xff   : > { %1146 = vmatprep.subr.mxu1 %v1088_v22 }
 0x103   : > { %v785_v23 = vld [vmem:[#allocation3 + $0x4] sm:$0xff]  ;;  %v786_v24 = vld [vmem:[#allocation3 + $0xc] sm:$0xff] }
 0x104   : > { %v871_v25 = vld [vmem:[#allocation3 + $0x6] sm:$0xff]  ;;  %1143 = vmatprep.mubr.msk.f32.mxu1 %vm692_vm5, %v785_v23  ;;  %v872_v26 = vld [vmem:[#allocation3 + $0xe] sm:$0xff] }
 0x105   : > { %963 = vst.msk [vmem:[#allocation3] sm:$0xf0] %vm962_vm6, %v691_v20  ;;  %1144 = vmatmul.mubr.msk.f32.vlgmr.msra.gmra.mrb[2].mxu1 %vm692_vm5, %v786_v24 }
 0x106   : > { %1147 = vmatpush3.msra.mxu1 %v1088_v22  ;;  %1148 = vmatprep.mubr.msk.f32.mxu1 %vm692_vm5, %v871_v25 }
 0x10d   : > { %1149 = vmatmul.mubr.msk.f32.vlgmr.msra.gmra.mrb[2].mxu1 %vm692_vm5, %v872_v26 }
 0x1e0   : > { %v1150_v29 = vpop.f32.mrb[2].mxu1 }
 0x1e1   : > { %v1153_v30 = vadd.f32 %v1150_v29, %v1083_v27  ;;  %v947_v31 = vpop.f32.mrb[3].mxu1 }
 0x1e2   : > { %v1154_v32 = vadd.f32 %v1083_v27, %v947_v31 }
 0x1e3   : > { %v959_v34 = vmax.f32 %v1153_v30, 0.0 }
 0x1e4   : > { %v958_v36 = vmax.f32 %v1154_v32, 0.0 }
 0x1e5   : > { %v965_v37 = vadd.f32 %v959_v34, %v508_v33 }
 0x1e6   : > { %v964_v38 = vadd.f32 %v958_v36, %v503_v35 }
 0x1e7   : > { %v967_v39 = vmax.f32 %v965_v37, 0.0 }
 0x1e8   : > { %v966_v40 = vmax.f32 %v964_v38, 0.0 }
 0x1e9   : > { %969 = vst.msk [vmem:[%s316_s13 + $0x8] sm:$0xff] %vm692_vm5, %v967_v39 }
 0x1ea   : > { %968 = vst.msk [vmem:[%s316_s13] sm:$0xff] %vm692_vm5, %v966_v40 }
 0x1eb PF: > { %s17_s26 = sadd.s32 1, %s1210_s26   ;;  %s1359_s24 = smov %s1206_s25 }
 0x1ec   : > { %p14_p5 = scmp.ge.s32.totalorder %s17_s26, 4   ;;  %s1360_s25 = smov %s1362_s27 }
 0x1ee   :  { %16 = sbr.rel (!%p14_p5) target bundleno = 2 (0x2), region = 86 }

</bundles_post_ra>
